<compile_context>
chip_gen: v7x
topology: tpu7x:2x2x1
jax: 0.10.0
libtpu: 0.0.40
codegen_flags: <defaults>
</compile_context>

<pallas_src>
import math

import jax
import jax.numpy as jnp
from jax import lax
from jax.experimental import pallas as pl
from jax.experimental.pallas import tpu as pltpu


def _pad128(n):
    return ((n + 127) // 128) * 128


def _vmem_plan(override_per_buffer=None):
    """Returns (vmem_limit_bytes, per-streamed-buffer budget in bytes)."""
    try:
        cap = int(pltpu.get_tpu_info().vmem_capacity_bytes)
    except Exception:
        cap = None
    if cap is not None and cap <= (64 << 20):
        limit, per_buf = 44 << 20, 10 << 20      # v7x-class: 64 MiB physical VMEM
    elif cap is None:
        limit, per_buf = 32 << 20, 8 << 20       # unknown hardware: conservative
    else:
        limit, per_buf = 64 << 20, 16 << 20      # v5e / v6e: 128 MiB physical VMEM
    if override_per_buffer is not None:
        per_buf = max(1024, int(override_per_buffer))
        limit = max(limit, 4 * per_buf)
    return limit, per_buf


def _tensorcores_per_chip():
    try:
        kind = jax.devices()[0].device_kind.lower()
    except Exception:
        return 1
    # v7x-class chips expose 2 TensorCores per device; v5e/v6e have 1.
    return 2 if "v7" in kind else 1


def _pick_rows(total, unit, row_bytes, budget_bytes):
    """Leading-dim tile size: full extent if it fits in `budget_bytes`,
    otherwise the largest multiple of lcm(unit, 8) that fits."""
    cap = max(1, budget_bytes // max(1, row_bytes))
    if total <= cap:
        return total
    step = (unit * 8) // math.gcd(unit, 8)
    return max(step, (cap // step) * step)


def _pass1_packing(N, M, D, H):
    """Rows-per-packed-row p = k*M for pass-1 lane packing, or 0 to disable."""
    if D >= 128 or H > 256:
        return 0
    for k in range(1, 129):
        p = k * M
        if p * D > 512:
            break
        if N % k:
            continue
        if (p * D) % 128:
            continue
        if (p * D) * (p * H) * 4 > (4 << 20):    # resident block-diag W1 cap
            continue
        return p
    return 0


# -----------------------------------------------------------------------------
# Pass 1 kernels: accumulate per-metapath projection scores.
# -----------------------------------------------------------------------------
def _make_packed_score_kernel(tile_rows, total_rows, tiles_per_core, ragged):
    # zp_ref: (TR, p*D), w1_ref: (p*D, p*H) block-diagonal, b1_ref: (1, p*H)
    # acc_ref: (1, 1, p*H) column-sum accumulator (per core slice).
    def kernel(zp_ref, w1_ref, b1_ref, acc_ref):
        c = pl.program_id(0)
        i = pl.program_id(1)

        @pl.when(i == 0)
        def _():
            acc_ref[...] = jnp.zeros_like(acc_ref)

        h = jnp.tanh(
            jnp.dot(zp_ref[...], w1_ref[...], preferred_element_type=jnp.float32)
            + b1_ref[...]
        )                                                       # (TR, p*H) f32
        if ragged:
            row0 = (c * tiles_per_core + i) * tile_rows
            row = row0 + lax.broadcasted_iota(jnp.int32, (tile_rows, 1), 0)
            h = jnp.where(row < total_rows, h, 0.0)             # select, not 0*NaN
        acc_ref[...] += jnp.sum(h, axis=0)[None, None, :]

    return kernel


def _make_flat_score_kernel(tile_rows, total_rows, tiles_per_core, ragged):
    # z_ref: (TR, D), w1_ref: (D, H), b1_ref: (1, H), g_ref: (M, TR)
    # acc_ref: (1, M, H) per-metapath accumulator (per core slice).
    def kernel(z_ref, w1_ref, b1_ref, g_ref, acc_ref):
        c = pl.program_id(0)
        i = pl.program_id(1)

        @pl.when(i == 0)
        def _():
            acc_ref[...] = jnp.zeros_like(acc_ref)

        h = jnp.tanh(
            jnp.dot(z_ref[...], w1_ref[...], preferred_element_type=jnp.float32)
            + b1_ref[...]
        )                                                       # (TR, H) f32
        if ragged:
            row0 = (c * tiles_per_core + i) * tile_rows
            row = row0 + lax.broadcasted_iota(jnp.int32, (tile_rows, 1), 0)
            h = jnp.where(row < total_rows, h, 0.0)
        # Group-by-metapath reduction as a small MXU matmul: (M, TR) @ (TR, H).
        acc_ref[...] += jnp.dot(g_ref[...], h, preferred_element_type=jnp.float32)[None]

    return kernel


# -----------------------------------------------------------------------------
# Pass 2 kernels: out[n, :] = sum_m beta[m] * z[n, m, :]
# -----------------------------------------------------------------------------
def _packed_weighted_sum_kernel(zp_ref, s_ref, out_ref):
    # (TB, r*M*D) @ (r*M*D, r*D) -> (TB, r*D): lane-dense output store.
    out_ref[...] = jnp.dot(
        zp_ref[...], s_ref[...], preferred_element_type=jnp.float32
    ).astype(out_ref.dtype)


def _make_general_weighted_sum_kernel(num_metapaths):
    # beta_ref: (M,) f32 scalars in SMEM; z_ref: (TN, M, D); out_ref: (TN, D).
    def kernel(beta_ref, z_ref, out_ref):
        acc = z_ref[:, 0, :].astype(jnp.float32) * beta_ref[0]
        for m in range(1, num_metapaths):
            acc = acc + z_ref[:, m, :].astype(jnp.float32) * beta_ref[m]
        out_ref[...] = acc.astype(out_ref.dtype)

    return kernel


# -----------------------------------------------------------------------------
# Wrapper
# -----------------------------------------------------------------------------
def semantic_attention(z, w1, b1, w2, *, per_buffer_bytes=None):
    N, M, D = z.shape
    H = w1.shape[1]
    itemsize = jnp.dtype(z.dtype).itemsize
    f32 = jnp.float32

    vmem_limit, per_buf = _vmem_plan(per_buffer_bytes)
    cores = _tensorcores_per_chip()

    cost1 = pl.CostEstimate(
        flops=int(2 * N * M * D * H),
        transcendentals=int(N * M * H),
        bytes_accessed=int(N * M * D * itemsize + D * H * itemsize + M * H * 4),
    )

    # ------------------- pass 1: per-metapath score accumulation -------------
    p = _pass1_packing(N, M, D, H)
    if p:
        k = p // M
        pD, pH = p * D, p * H
        rows = (N * M) // p
        zp = z.reshape(rows, pD)                       # free: contiguous HBM view
        w1bd = jnp.kron(jnp.eye(p, dtype=f32), w1.astype(f32)).astype(z.dtype)
        b1p = jnp.tile(b1.reshape(1, H).astype(f32), (1, p))

        tr = _pick_rows(rows, 1, pD * itemsize, per_buf)
        tiles = pl.cdiv(rows, tr)
        C = cores if (cores > 1 and tiles >= 2 * cores and tiles % cores == 0) else 1
        tiles_per_core = tiles // C
        ragged = (rows % tr) != 0

        acc = pl.pallas_call(
            _make_packed_score_kernel(tr, rows, tiles_per_core, ragged),
            out_shape=jax.ShapeDtypeStruct((C, 1, pH), f32),
            grid=(C, tiles_per_core),
            in_specs=[
                pl.BlockSpec((tr, pD), lambda c, i: (c * tiles_per_core + i, 0)),
                pl.BlockSpec((pD, pH), lambda c, i: (0, 0)),
                pl.BlockSpec((1, pH), lambda c, i: (0, 0)),
            ],
            out_specs=pl.BlockSpec((1, 1, pH), lambda c, i: (c, 0, 0)),
            compiler_params=pltpu.CompilerParams(
                dimension_semantics=("parallel", "arbitrary"),
                vmem_limit_bytes=vmem_limit),
            cost_estimate=cost1,
        )(zp, w1bd, b1p)
        # Lane j*H + h of the column sum belongs to metapath j % M (M divides p).
        t = acc.sum(axis=0).reshape(p, H).reshape(k, M, H).sum(axis=0)   # (M, H)
    else:
        rows = N * M
        z2 = z.reshape(rows, D)                        # free: contiguous HBM view
        row_bytes = _pad128(D) * itemsize + ((M + 7) // 8) * 8 * 4
        tr = _pick_rows(rows, M, row_bytes, per_buf)   # multiple of M (or == rows)
        tiles = pl.cdiv(rows, tr)
        C = cores if (cores > 1 and tiles >= 2 * cores and tiles % cores == 0) else 1
        tiles_per_core = tiles // C
        ragged = (rows % tr) != 0
        # G[m, r] = 1 iff local row r belongs to metapath m (tr % M == 0 or tr == rows).
        g = (jnp.arange(tr)[None, :] % M == jnp.arange(M)[:, None]).astype(f32)

        acc = pl.pallas_call(
            _make_flat_score_kernel(tr, rows, tiles_per_core, ragged),
            out_shape=jax.ShapeDtypeStruct((C, M, H), f32),
            grid=(C, tiles_per_core),
            in_specs=[
                pl.BlockSpec((tr, D), lambda c, i: (c * tiles_per_core + i, 0)),
                pl.BlockSpec((D, H), lambda c, i: (0, 0)),
                pl.BlockSpec((1, H), lambda c, i: (0, 0)),
                pl.BlockSpec((M, tr), lambda c, i: (0, 0)),
            ],
            out_specs=pl.BlockSpec((1, M, H), lambda c, i: (c, 0, 0)),
            compiler_params=pltpu.CompilerParams(
                dimension_semantics=("parallel", "arbitrary"),
                vmem_limit_bytes=vmem_limit),
            cost_estimate=cost1,
        )(z2, w1.astype(z.dtype), b1.reshape(1, H).astype(f32), g)
        t = acc.sum(axis=0)                                               # (M, H)

    # ---- tiny epilogue in plain JAX: mean over true N, w2 projection, softmax
    s_mean = jnp.dot(t, w2.reshape(H, 1).astype(f32)) / N                 # (M, 1)
    beta = jax.nn.softmax(s_mean, axis=0)                                 # (M, 1) f32

    # ------------------- pass 2: beta-weighted sum over metapaths ------------
    cost2 = pl.CostEstimate(
        flops=int(2 * N * M * D),
        transcendentals=0,
        bytes_accessed=int(N * M * D * itemsize + N * D * itemsize),
    )

    # Pack r nodes per output row so stores are (close to) 128-lane dense.
    r = 0
    if D < 128 and 128 % D == 0:
        for cand in range(128 // D, 1, -1):
            if N % cand == 0:
                r = cand
                break

    if r > 1:
        rows = N // r
        zp = z.reshape(rows, r * M * D)                # free: contiguous HBM view
        # S[(j*M + m)*D + d, j*D + d'] = beta[m] * (d == d')
        s_mat = jnp.kron(
            jnp.eye(r, dtype=f32),
            jnp.kron(beta, jnp.eye(D, dtype=f32)),
        ).astype(z.dtype)                              # (r*M*D, r*D)
        row_bytes = (r * M * D + r * D) * itemsize
        tb = _pick_rows(rows, 1, row_bytes, per_buf)
        out_p = pl.pallas_call(
            _packed_weighted_sum_kernel,
            out_shape=jax.ShapeDtypeStruct((rows, r * D), z.dtype),
            grid=(pl.cdiv(rows, tb),),
            in_specs=[
                pl.BlockSpec((tb, r * M * D), lambda i: (i, 0)),
                pl.BlockSpec((r * M * D, r * D), lambda i: (0, 0)),
            ],
            out_specs=pl.BlockSpec((tb, r * D), lambda i: (i, 0)),
            compiler_params=pltpu.CompilerParams(
                dimension_semantics=("parallel",),
                vmem_limit_bytes=vmem_limit),
            cost_estimate=cost2,
        )(zp, s_mat)
        return out_p.reshape(N, D)                     # free, contiguous

    # General path: D >= 128 (already lane-dense) or N not packable without an
    # extra HBM copy of z.  beta is read as SMEM scalars; M-term unrolled MAC.
    row_bytes = (M + 1) * _pad128(D) * itemsize
    tn = _pick_rows(N, 1, row_bytes, per_buf)
    return pl.pallas_call(
        _make_general_weighted_sum_kernel(M),
        out_shape=jax.ShapeDtypeStruct((N, D), z.dtype),
        grid=(pl.cdiv(N, tn),),
        in_specs=[
            pl.BlockSpec(memory_space=pltpu.MemorySpace.SMEM),
            pl.BlockSpec((tn, M, D), lambda i: (i, 0, 0)),
        ],
        out_specs=pl.BlockSpec((tn, D), lambda i: (i, 0)),
        compiler_params=pltpu.CompilerParams(
            dimension_semantics=("parallel",),
            vmem_limit_bytes=vmem_limit),
        cost_estimate=cost2,
    )(beta.reshape(M), z)


def semantic_attention_ref(z, w1, b1, w2):
    # Pure-JAX reference mirroring the PyTorch module.
    h = jnp.tanh(jnp.einsum("nmd,dh->nmh", z, w1) + b1.reshape(1, 1, -1))
    s = jnp.einsum("nmh,ho->nmo", h, w2)               # (N, M, 1)
    w = s.mean(0)                                      # (M, 1)
    beta = jax.nn.softmax(w, axis=0)                   # (M, 1)
    return (beta[None, :, :] * z).sum(1)               # (N, D)


def _run_case(key, N, M, D, H, **kwargs):
    kz, kw1, kb1, kw2 = jax.random.split(key, 4)
    z = jax.random.normal(kz, (N, M, D), dtype=jnp.float32)
    w1 = jax.random.normal(kw1, (D, H), dtype=jnp.float32) * 0.1
    b1 = jax.random.normal(kb1, (1, H), dtype=jnp.float32) * 0.1
    w2 = jax.random.normal(kw2, (H, 1), dtype=jnp.float32) * 0.1

    out = jax.block_until_ready(semantic_attention(z, w1, b1, w2, **kwargs))
    ref = semantic_attention_ref(z, w1, b1, w2)
    assert out.shape == (N, D), (out.shape, (N, D))
    err = float(jnp.max(jnp.abs(out - ref)))
    assert bool(jnp.allclose(out, ref, atol=2e-4, rtol=2e-4)), f"max abs err={err}"


if __name__ == "__main__":
    key = jax.random.PRNGKey(0)
    k1, k2, k3, k4, k5 = jax.random.split(key, 5)

    # Small TAHIN-like case: packed pass-1 with k>1 (p=k*M), packed pass-2 (r=4).
    _run_case(k1, N=8, M=2, D=32, H=32)
    # Module-default hidden size: packed both passes (p*D = 128, r = 2).
    _run_case(k2, N=64, M=2, D=64, H=128)
    # D >= 128: flat pass-1 (G-matmul) + general SMEM-beta pass-2 (M = 3).
    _run_case(k3, N=16, M=3, D=128, H=64)
    # Force multi-tile streaming + ragged last tile in pass 1; pass-2 packs
    # r = 3 nodes per output row (201 % 3 == 0).
    _run_case(k4, N=201, M=4, D=32, H=32, per_buffer_bytes=4096)
    # Multi-tile packed pass-2 with a ragged last tile (no accumulation there).
    _run_case(k5, N=200, M=4, D=32, H=32, per_buffer_bytes=4096)

    print("KERNEL_OK")
</pallas_src>

<mosaic_0001>
module attributes {stable_mosaic.version = 11 : i64} {
  func.func @kernel(%arg0: i32, %arg1: i32, %arg2: memref<4x128xf32, #tpu.memory_space<vmem>>, %arg3: memref<128x128xf32, #tpu.memory_space<vmem>>, %arg4: memref<1x128xf32, #tpu.memory_space<vmem>>, %arg5: memref<1x1x128xf32, #tpu.memory_space<vmem>>) attributes {dimension_semantics = [#tpu.dimension_semantics<parallel>, #tpu.dimension_semantics<arbitrary>], iteration_bounds = array<i64: 1, 1>, scalar_prefetch = 0 : i64, scratch_operands = 0 : i64, tpu.core_type = #tpu.core_type<tc>, window_params = [{transform_indices = @transform_0, window_bounds = array<i64: 4, 128>}, {pipeline_mode = #tpu.pipeline_mode<synchronous>, transform_indices = @transform_1, window_bounds = array<i64: 128, 128>}, {pipeline_mode = #tpu.pipeline_mode<synchronous>, transform_indices = @transform_2, window_bounds = array<i64: 1, 128>}, {transform_indices = @transform_3, window_bounds = array<i64: 1, 1, 128>}]} {
    %c0_i32 = arith.constant 0 : i32
    %0 = arith.cmpi eq, %arg1, %c0_i32 : i32
    %1 = arith.extui %0 : i1 to i32
    %c0_i32_0 = arith.constant 0 : i32
    %2 = arith.cmpi ne, %1, %c0_i32_0 : i32
    scf.if %2 {
      %cst_13 = arith.constant 0.000000e+00 : f32
      %15 = vector.broadcast %cst_13 : f32 to vector<1x1x128xf32>
      %c0_14 = arith.constant 0 : index
      %c0_15 = arith.constant 0 : index
      %c0_16 = arith.constant 0 : index
      %16 = vector.load %arg5[%c0_14, %c0_15, %c0_16] : memref<1x1x128xf32, #tpu.memory_space<vmem>>, vector<1x1x128xf32>
      tpu.vector_store %arg5[%c0_14, %c0_15, %c0_16], %15 {strides = array<i32>} : memref<1x1x128xf32, #tpu.memory_space<vmem>>, vector<1x1x128xf32>,
    } else {
    }
    %c0 = arith.constant 0 : index
    %c0_1 = arith.constant 0 : index
    %3 = vector.load %arg2[%c0, %c0_1] : memref<4x128xf32, #tpu.memory_space<vmem>>, vector<4x128xf32>
    %c0_2 = arith.constant 0 : index
    %c0_3 = arith.constant 0 : index
    %4 = vector.load %arg3[%c0_2, %c0_3] : memref<128x128xf32, #tpu.memory_space<vmem>>, vector<128x128xf32>
    %cst = arith.constant dense<0.000000e+00> : vector<4x128xf32>
    %5 = tpu.matmul %3, %4, %cst {dimension_numbers = #tpu.dot_dimension_numbers<[1], [0], [0], [1], [0, 0, 1, 1], [], []>} : vector<4x128xf32>, vector<128x128xf32>, vector<4x128xf32> -> vector<4x128xf32>
    %c0_4 = arith.constant 0 : index
    %c0_5 = arith.constant 0 : index
    %6 = vector.load %arg4[%c0_4, %c0_5] : memref<1x128xf32, #tpu.memory_space<vmem>>, vector<1x128xf32>
    %7 = vector.broadcast %6 : vector<1x128xf32> to vector<4x128xf32>
    %8 = arith.addf %5, %7 : vector<4x128xf32>
    %9 = math.tanh %8 : vector<4x128xf32>
    %c0_6 = arith.constant 0 : index
    %c0_7 = arith.constant 0 : index
    %c0_8 = arith.constant 0 : index
    %10 = vector.load %arg5[%c0_6, %c0_7, %c0_8] : memref<1x1x128xf32, #tpu.memory_space<vmem>>, vector<1x1x128xf32>
    %cst_9 = arith.constant dense<0.000000e+00> : vector<128xf32>
    %11 = vector.multi_reduction <add>, %9, %cst_9 [0] : vector<4x128xf32> to vector<128xf32>
    %12 = vector.shape_cast %11 : vector<128xf32> to vector<1x1x128xf32>
    %13 = arith.addf %10, %12 : vector<1x1x128xf32>
    %c0_10 = arith.constant 0 : index
    %c0_11 = arith.constant 0 : index
    %c0_12 = arith.constant 0 : index
    %14 = vector.load %arg5[%c0_10, %c0_11, %c0_12] : memref<1x1x128xf32, #tpu.memory_space<vmem>>, vector<1x1x128xf32>
    tpu.vector_store %arg5[%c0_10, %c0_11, %c0_12], %13 {strides = array<i32>} : memref<1x1x128xf32, #tpu.memory_space<vmem>>, vector<1x1x128xf32>,
    return
  }
  func.func @transform_0(%arg0: i32, %arg1: i32) -> (i32, i32) {
    %c1_i32 = arith.constant 1 : i32
    %0 = arith.muli %arg0, %c1_i32 : i32
    %1 = arith.addi %0, %arg1 : i32
    %c0_i32 = arith.constant 0 : i32
    %c0_i32_0 = arith.constant 0 : i32
    return %1, %c0_i32 : i32, i32
  }
  func.func @transform_1(%arg0: i32, %arg1: i32) -> (i32, i32) {
    %c0_i32 = arith.constant 0 : i32
    %c0_i32_0 = arith.constant 0 : i32
    %c0_i32_1 = arith.constant 0 : i32
    return %c0_i32, %c0_i32_0 : i32, i32
  }
  func.func @transform_2(%arg0: i32, %arg1: i32) -> (i32, i32) {
    %c0_i32 = arith.constant 0 : i32
    %c0_i32_0 = arith.constant 0 : i32
    %c0_i32_1 = arith.constant 0 : i32
    return %c0_i32, %c0_i32_0 : i32, i32
  }
  func.func @transform_3(%arg0: i32, %arg1: i32) -> (i32, i32, i32) {
    %c0_i32 = arith.constant 0 : i32
    %c0_i32_0 = arith.constant 0 : i32
    %c0_i32_1 = arith.constant 0 : i32
    return %arg0, %c0_i32, %c0_i32_0 : i32, i32, i32
  }
}

</mosaic_0001>

<bundles_post_ra>
// kernel: tpu_custom_call.1
= control target key start
LH: loop header
LB: loop body
LE: loop exit
PB: predicated region body
PF: predicated region fallthrough
CT: control target
= control target key end

     0   :  { %8 = vsyncpa [#allocation3], 0  ;;  %s405_s0 = inlined_call_operand.hbm [shape: f32[4,128], index: 0, kind: input, shape index: {}]   ;;  %s406_s1 = inlined_call_operand.hbm [shape: f32[128,128], index: 1, kind: input, shape index: {}]   ;;  %s407_s2 = inlined_call_operand.vmem [shape: f32[1,128], index: 2, kind: input, shape index: {}]   ;;  %s408_s3 = inlined_call_operand.hbm [shape: f32[1,1,128], index: 3, kind: output, shape index: {}]  }
   0x1   :  { %9 = vsyncpa [#allocation6], 0 }
   0x2   :  { %10 = vsyncpa [#allocation4], 0  ;;  %s331_s12 = smov [#allocation2]   ;;  %s332_s14 = smov [#allocation5]  }
   0x3   :  { %s20_s13 = sshll.u32 %s331_s12, 4  ;;  %s29_s15 = sshll.u32 %s332_s14, 4  ;;  %s21_s13 = int_to_ptr.vmem [resolvable:$true] %s20_s13  ;;  %s359_s15 = int_to_ptr.vmem [resolvable:$true] %s29_s15 }
   0x4   :  { %s259_s18 = scalar_lea.hbm %s405_s0, 64 }
   0x5   :  { %p260_p0 = scmp.ne.s32.totalorder %s405_s0, %s259_s18  ;;  %p263_p1 = scmp.lt.u32.totalorder %s259_s18, %s405_s0 }
   0x7   :  { %p265_p2 = pnand %p263_p1, %p260_p0 }
   0x9   :  { %268 = shalt.err (!%p265_p2)
}
   0xa   :  { %s269_s23 = scalar_lea.vmem %s21_s13, 64  ;;  %p274_p4 = scmp.lt.s32.totalorder %s21_s13, %s21_s13 }
   0xb   :  { %p270_p3 = scmp.ne.s32.totalorder %s21_s13, %s269_s23  ;;  %p275_p5 = scmp.lt.s32.totalorder %s269_s23, %s269_s23 }
   0xd   :  { %p276_p6 = por %p275_p5, %p274_p4 }
   0xf   :  { %p277_p7 = pnand %p276_p6, %p270_p3 }
  0x11   :  { %280 = shalt.err (!%p277_p7)
}
  0x12   :  { %23 = dma.hbm_to_vmem [thread:$0]  %s405_s0, 64, %s21_s13, [#allocation3]  }
  0x13   :  { %s281_s28 = scalar_lea.hbm %s406_s1, 2048 }
  0x14   :  { %p282_p8 = scmp.ne.s32.totalorder %s406_s1, %s281_s28  ;;  %p285_p9 = scmp.lt.u32.totalorder %s281_s28, %s406_s1 }
  0x16   :  { %p287_p10 = pnand %p285_p9, %p282_p8 }
  0x18   :  { %290 = shalt.err (!%p287_p10)
}
  0x19   :  { %s291_s6 = scalar_lea.vmem %s359_s15, 2048  ;;  %p296_p12 = scmp.lt.s32.totalorder %s359_s15, %s359_s15 }
  0x1a   :  { %p292_p11 = scmp.ne.s32.totalorder %s359_s15, %s291_s6  ;;  %p297_p13 = scmp.lt.s32.totalorder %s291_s6, %s291_s6 }
  0x1c   :  { %p298_p0 = por %p297_p13, %p296_p12 }
  0x1e   :  { %p299_p1 = pnand %p298_p0, %p292_p11 }
  0x20   :  { %302 = shalt.err (!%p299_p1)
}
  0x21   :  { %s333_s0 = smov 128   ;;  %s334_s7 = smov 8  }
  0x22   :  { %35 = dma.hbm_to_vmem [thread:$0]  %s406_s1, 2048, %s359_s15, [#allocation6], %s333_s0, %s333_s0, %s334_s7  }
  0x23   :  { %325 = dma.done.wait [#allocation3], 64  }
  0x24   :  { %326 = vsyncadd [#allocation3], 4294967232 }
  0x25   :  { %327 = dma.done.wait [#allocation6], 2048  }
  0x26   :  { %328 = vsyncadd [#allocation6], 4294965248  ;;  %v335_v0 = vmov 0.0|0.0   ;;  %v336_v1 = vmov 0.0   ;;  %vm337_vm0 = vmmov 0   ;;  %v51_v2 = vld [vmem:[#allocation5] sm:$0xff] }
  0x27   :  { %225 = vmatprep.subr.bf16.mxu0 %v335_v0  ;;  %49 = vst [vmem:[#allocation7] sm:$0x1] %v336_v1  ;;  %222 = vmatprep.mubr.msk.f32.mxu0 %vm337_vm0, %v336_v1  ;;  %v52_v3 = vld [vmem:[#allocation5 + $0x8] sm:$0xff]  ;;  %v53_v4 = vld [vmem:[#allocation5 + $0x10] sm:$0xff]  ;;  %v54_v6 = vld [vmem:[#allocation5 + $0x18] sm:$0xff]  ;;  %vm146_vm1 = vcmask 1043456  }
  0x28   :  { %v226_v5 = vpack.c.bf16 %v52_v3, %v51_v2  ;;  %v229_v7 = vpack.c.bf16 %v54_v6, %v53_v4  ;;  %v55_v8 = vld [vmem:[#allocation5 + $0x20] sm:$0xff]  ;;  %v56_v9 = vld [vmem:[#allocation5 + $0x28] sm:$0xff]  ;;  %v57_v11 = vld [vmem:[#allocation5 + $0x30] sm:$0xff]  ;;  %s338_s11 = smov [#allocation7]  }
  0x29   :  { %v232_v10 = vpack.c.bf16 %v56_v9, %v55_v8  ;;  %v58_v12 = vld [vmem:[#allocation5 + $0x38] sm:$0xff]  ;;  %v59_v14 = vld [vmem:[#allocation5 + $0x40] sm:$0xff]  ;;  %v60_v15 = vld [vmem:[#allocation5 + $0x48] sm:$0xff]  ;;  %s162_s12 = sshll.u32 %s338_s11, 4  ;;  %s163_s12 = int_to_ptr.vmem [resolvable:$true] %s162_s12 }
  0x2a   :  { %227 = vmatpush3.bf16.msra.mxu0 %v226_v5  ;;  %v235_v13 = vpack.c.bf16 %v58_v12, %v57_v11  ;;  %v238_v16 = vpack.c.bf16 %v60_v15, %v59_v14  ;;  %v61_v17 = vld [vmem:[#allocation5 + $0x50] sm:$0xff]  ;;  %v62_v18 = vld [vmem:[#allocation5 + $0x58] sm:$0xff]  ;;  %v63_v20 = vld [vmem:[#allocation5 + $0x60] sm:$0xff]  ;;  %s307_s13 = scalar_lea.vmem %s163_s12, 32  ;;  %p308_p3 = scmp.lt.s32.totalorder %s163_s12, %s163_s12 }
  0x2b   :  { %228 = vmatprep.subr.bf16.mxu0 %v335_v0  ;;  %v241_v19 = vpack.c.bf16 %v62_v18, %v61_v17  ;;  %v64_v21 = vld [vmem:[#allocation5 + $0x68] sm:$0xff]  ;;  %v65_v23 = vld [vmem:[#allocation5 + $0x70] sm:$0xff]  ;;  %v66_v24 = vld [vmem:[#allocation5 + $0x78] sm:$0xff] }
  0x2c   :  { %v244_v22 = vpack.c.bf16 %v64_v21, %v63_v20  ;;  %v247_v25 = vpack.c.bf16 %v66_v24, %v65_v23  ;;  %v50_v26 = vld [vmem:[#allocation2] sm:$0xf] }
  0x2d   :  { %v172_v27 = vld [vmem:[%s407_s2] ss:$0 sm:$0xff]  ;;  %s303_s2 = scalar_lea.vmem %s163_s12, 16 }
  0x2e   :  { %230 = vmatpush3.bf16.msra.mxu0 %v229_v7  ;;  %v145_v38 = vld [vmem:[#allocation7] sm:$0x1]  ;;  %p304_p2 = scmp.ne.s32.totalorder %s163_s12, %s303_s2  ;;  %p309_p4 = scmp.lt.s32.totalorder %s307_s13, %s303_s2 }
  0x2f   :  { %231 = vmatprep.subr.bf16.mxu0 %v335_v0 }
  0x30   :  { %p310_p5 = por %p309_p4, %p308_p3 }
  0x32   :  { %233 = vmatpush3.bf16.msra.mxu0 %v232_v10  ;;  %p311_p6 = pnand %p310_p5, %p304_p2 }
  0x33   :  { %234 = vmatprep.subr.bf16.mxu0 %v335_v0 }
  0x36   :  { %236 = vmatpush3.bf16.msra.mxu0 %v235_v13 }
  0x37   :  { %237 = vmatprep.subr.bf16.mxu0 %v335_v0 }
  0x3a   :  { %239 = vmatpush3.bf16.msra.mxu0 %v238_v16 }
  0x3b   :  { %240 = vmatprep.subr.bf16.mxu0 %v335_v0 }
  0x3e   :  { %242 = vmatpush3.bf16.msra.mxu0 %v241_v19 }
  0x3f   :  { %243 = vmatprep.subr.bf16.mxu0 %v335_v0 }
  0x42   :  { %245 = vmatpush3.bf16.msra.mxu0 %v244_v22 }
  0x43   :  { %246 = vmatprep.subr.bf16.mxu0 %v335_v0 }
  0x46   :  { %248 = vmatpush3.bf16.msra.mxu0 %v247_v25 }
  0x49   :  { %223 = vmatmul.mubr.f32.vlgmr.msra.gmra.mrb[0].mxu0 %v50_v26 }
 0x11c   :  { %v140_v28 = vpop.f32.mrb[0].mxu0 }
 0x11d   :  { %v141_v29 = vadd.f32 %v172_v27, %v140_v28  ;;  %v224_v30 = vpop.f32.mrb[1].mxu0 }
 0x11f   :  { %257 = vtanh.f32 %v141_v29 }
 0x129   :  { %v258_v31 = vpop.eup %257 }
 0x12a   :  { %v147_v32 = vsel %vm146_vm1, %v258_v31, 0.0 }
 0x12b   :  { %v148_v33 = vrot.slane %v147_v32, 4 }
 0x12d   :  { %v149_v34 = vadd.f32 %v148_v33, %v147_v32 }
 0x12f   :  { %v150_v35 = vrot.slane %v149_v34, 2 }
 0x131   :  { %v151_v36 = vadd.f32 %v150_v35, %v149_v34 }
 0x133   :  { %v152_v37 = vrot.slane %v151_v36, 1 }
 0x135   :  { %v153_v39 = vadd.f32 %v152_v37, %v151_v36 }
 0x137   :  { %v154_v40 = vadd.f32 %v153_v39, %v145_v38 }
 0x139   :  { %155 = vst [vmem:[#allocation7] sm:$0x1] %v154_v40 }
 0x13a   :  { %314 = shalt.err (!%p311_p6)
}
 0x13b   :  { %s315_s16 = scalar_lea.hbm %s408_s3, 16 }
 0x13c   :  { %p316_p7 = scmp.ne.s32.totalorder %s408_s3, %s315_s16  ;;  %p319_p8 = scmp.lt.u32.totalorder %s315_s16, %s408_s3 }
 0x13e   :  { %p321_p9 = pnand %p319_p8, %p316_p7 }
 0x140   :  { %324 = shalt.err (!%p321_p9)
}
 0x141   :  { %165 = dma.vmem_to_hbm [thread:$0]  %s163_s12, 16, %s408_s3, [#allocation4]  }
 0x142   :  { %329 = dma.done.wait [#allocation4], 16  }
 0x143   :  { %330 = vsyncadd [#allocation4], 4294967280 }
 0x144   :  { %169 = vsyncpa [#allocation3], 1 }
 0x145   :  { %170 = vsyncpa [#allocation6], 1 }
 0x146   :  { %171 = vsyncpa [#allocation4], 1 }

</bundles_post_ra>
